<compile_context>
chip_gen: v7x
topology: tpu7x:2x2x1
jax: 0.10.0
libtpu: 0.0.40
codegen_flags: <defaults>
</compile_context>

<pallas_src>
import jax
import jax.numpy as jnp
from jax.experimental import pallas as pl
from jax.experimental.pallas import tpu as pltpu


def _make_kernel(H, W, margin):
    HW = H * W

    def conv3x3_im2col(src, col, xpad_ref, patch_ref, wm, bias):
        """3x3 'same' conv of src:(Cin, HW) with wm:(Cout, 9*Cin) -> (Cout, HW)."""
        cin = src.shape[0]
        zeros_m = jnp.zeros((cin, margin), jnp.float32)
        # zero halo margins + place the image at a lane-aligned offset
        xpad_ref[:, :margin] = zeros_m
        xpad_ref[:, margin + HW:] = zeros_m
        xpad_ref[:, margin:margin + HW] = src
        # im2col: 9 shifted flat views of the padded buffer; columns that would
        # wrap across a row boundary are masked to zero.
        t = 0
        for dh in (-1, 0, 1):
            for dw in (-1, 0, 1):
                off = dh * W + dw
                tap = xpad_ref[:, margin + off: margin + off + HW]
                if dw != 0:
                    valid = (col + dw >= 0) & (col + dw < W)
                    tap = jnp.where(valid, tap, 0.0)
                patch_ref[t * cin:(t + 1) * cin, :] = tap
                t += 1
        # single MXU matmul per conv (K = 9*Cin), f32 accumulation
        y = jnp.dot(wm, patch_ref[...], preferred_element_type=jnp.float32)
        return y + bias                     # per-channel bias, broadcast over lanes

    def kernel(x_ref, wm1_ref, b1_ref, wm2_ref, b2_ref, out_ref,
               xpad1_ref, patch1_ref, xpad2_ref, patch2_ref):
        x = x_ref[0]                                              # (Cin, HW)
        # column-within-row index of every flattened pixel (for halo masking)
        col = jax.lax.broadcasted_iota(jnp.int32, (1, HW), 1) % W

        h1 = conv3x3_im2col(x, col, xpad1_ref, patch1_ref,
                            wm1_ref[...], b1_ref[...])
        h1 = jnp.maximum(h1, 0.0)                    # relu(bn1(conv1(x)))  -- stays in VMEM
        y2 = conv3x3_im2col(h1, col, xpad2_ref, patch2_ref,
                            wm2_ref[...], b2_ref[...])
        out_ref[0] = jnp.maximum(y2 + x, 0.0)        # bn2(conv2(.)) + residual, relu

    return kernel


def basic_block_forward(x_nchw, w1, s1, b1, w2, s2, b2):
    """x_nchw: (N, C, H, W) f32; w*: (3,3,Cin,Cout) HWIO; s*/b*: folded BN."""
    N, C, H, W = x_nchw.shape
    HW = H * W
    Cout = w1.shape[-1]
    assert w1.shape[2] == C and w2.shape[2] == Cout
    assert Cout == C, "identity residual requires inplanes == planes"

    x = x_nchw.reshape(N, C, HW).astype(jnp.float32)
    # Fold BN scale into the conv weights and lay weights out as (Cout, 9*Cin)
    # to match the im2col patch matrix row order (tap-major, cin-minor).
    wm1 = (w1.reshape(9 * C, Cout) * s1[None, :]).T.astype(jnp.float32)
    wm2 = (w2.reshape(9 * Cout, Cout) * s2[None, :]).T.astype(jnp.float32)
    b1c = b1.reshape(Cout, 1).astype(jnp.float32)
    b2c = b2.reshape(Cout, 1).astype(jnp.float32)

    margin = ((W + 1 + 127) // 128) * 128            # lane-aligned halo margin
    kernel = _make_kernel(H, W, margin)

    out = pl.pallas_call(
        kernel,
        out_shape=jax.ShapeDtypeStruct((N, Cout, HW), jnp.float32),
        grid=(N,),
        in_specs=[
            pl.BlockSpec((1, C, HW), lambda n: (n, 0, 0)),
            pl.BlockSpec((Cout, 9 * C), lambda n: (0, 0)),
            pl.BlockSpec((Cout, 1), lambda n: (0, 0)),
            pl.BlockSpec((Cout, 9 * Cout), lambda n: (0, 0)),
            pl.BlockSpec((Cout, 1), lambda n: (0, 0)),
        ],
        out_specs=pl.BlockSpec((1, Cout, HW), lambda n: (n, 0, 0)),
        scratch_shapes=[
            pltpu.VMEM((C, HW + 2 * margin), jnp.float32),     # conv1 halo buffer
            pltpu.VMEM((9 * C, HW), jnp.float32),              # conv1 im2col patches
            pltpu.VMEM((Cout, HW + 2 * margin), jnp.float32),  # conv2 halo buffer
            pltpu.VMEM((9 * Cout, HW), jnp.float32),           # conv2 im2col patches
        ],
        compiler_params=pltpu.CompilerParams(
            dimension_semantics=("parallel",)),
    )(x, wm1, b1c, wm2, b2c)

    return out.reshape(N, Cout, H, W)


def ref_forward(x_nchw, w1, s1, b1, w2, s2, b2):
    """Pure-JAX reference (same folded-BN semantics) for correctness check."""
    def conv(x, w):  # w: HWIO
        return jax.lax.conv_general_dilated(
            x, w, window_strides=(1, 1), padding=((1, 1), (1, 1)),
            dimension_numbers=('NCHW', 'HWIO', 'NCHW'))
    y = conv(x_nchw, w1)
    y = y * s1[None, :, None, None] + b1[None, :, None, None]
    y = jnp.maximum(y, 0.0)
    y = conv(y, w2)
    y = y * s2[None, :, None, None] + b2[None, :, None, None]
    y = y + x_nchw
    return jnp.maximum(y, 0.0)


def init_params(key, cin, cout, eps=1e-5):
    ks = jax.random.split(key, 10)
    def bn_fold(kg, kb, km, kv, c):
        gamma = 1.0 + 0.1 * jax.random.normal(kg, (c,), jnp.float32)
        beta = 0.1 * jax.random.normal(kb, (c,), jnp.float32)
        mean = 0.1 * jax.random.normal(km, (c,), jnp.float32)
        var = 1.0 + 0.1 * jax.random.uniform(kv, (c,), jnp.float32)
        scale = gamma / jnp.sqrt(var + eps)
        bias = beta - mean * scale
        return scale, bias
    w1 = 0.1 * jax.random.normal(ks[0], (3, 3, cin, cout), jnp.float32)
    w2 = 0.1 * jax.random.normal(ks[1], (3, 3, cout, cout), jnp.float32)
    s1, b1 = bn_fold(ks[2], ks[3], ks[4], ks[5], cout)
    s2, b2 = bn_fold(ks[6], ks[7], ks[8], ks[9], cout)
    return w1, s1, b1, w2, s2, b2


if __name__ == "__main__":
    key = jax.random.PRNGKey(0)
    kx, kp = jax.random.split(key)

    N, C, H, W = 2, 4, 16, 16          # inplanes = planes = 4 (identity residual)
    x = jax.random.normal(kx, (N, C, H, W), jnp.float32)
    params = init_params(kp, C, C)

    out = jax.jit(basic_block_forward)(x, *params)
    out = jax.block_until_ready(out)

    ref = ref_forward(x, *params)
    assert out.shape == (N, C, H, W)
    assert jnp.allclose(out, ref, atol=1e-4, rtol=1e-4), (
        float(jnp.max(jnp.abs(out - ref))))

    print("KERNEL_OK")
</pallas_src>

<mosaic_0001>
module attributes {stable_mosaic.version = 11 : i64} {
  func.func @kernel(%arg0: i32, %arg1: memref<1x4x256xf32, #tpu.memory_space<vmem>>, %arg2: memref<4x36xf32, #tpu.memory_space<vmem>>, %arg3: memref<4x1xf32, #tpu.memory_space<vmem>>, %arg4: memref<4x36xf32, #tpu.memory_space<vmem>>, %arg5: memref<4x1xf32, #tpu.memory_space<vmem>>, %arg6: memref<1x4x256xf32, #tpu.memory_space<vmem>>, %arg7: memref<4x512xf32, #tpu.memory_space<vmem>>, %arg8: memref<36x256xf32, #tpu.memory_space<vmem>>, %arg9: memref<4x512xf32, #tpu.memory_space<vmem>>, %arg10: memref<36x256xf32, #tpu.memory_space<vmem>>) attributes {dimension_semantics = [#tpu.dimension_semantics<parallel>], iteration_bounds = array<i64: 2>, scalar_prefetch = 0 : i64, scratch_operands = 4 : i64, tpu.core_type = #tpu.core_type<tc>, window_params = [{transform_indices = @transform_0, window_bounds = array<i64: 1, 4, 256>}, {pipeline_mode = #tpu.pipeline_mode<synchronous>, transform_indices = @transform_1, window_bounds = array<i64: 4, 36>}, {pipeline_mode = #tpu.pipeline_mode<synchronous>, transform_indices = @transform_2, window_bounds = array<i64: 4, 1>}, {pipeline_mode = #tpu.pipeline_mode<synchronous>, transform_indices = @transform_3, window_bounds = array<i64: 4, 36>}, {pipeline_mode = #tpu.pipeline_mode<synchronous>, transform_indices = @transform_4, window_bounds = array<i64: 4, 1>}, {transform_indices = @transform_5, window_bounds = array<i64: 1, 4, 256>}]} {
    %c0 = arith.constant 0 : index
    %c0_0 = arith.constant 0 : index
    %c0_1 = arith.constant 0 : index
    %0 = vector.load %arg1[%c0, %c0_0, %c0_1] : memref<1x4x256xf32, #tpu.memory_space<vmem>>, vector<1x4x256xf32>
    %1 = vector.shape_cast %0 : vector<1x4x256xf32> to vector<4x256xf32>
    %2 = tpu.iota {dimensions = array<i32: 1>} : vector<1x256xi32>
    %c16_i32 = arith.constant 16 : i32
    %c0_i32 = arith.constant 0 : i32
    %3 = arith.cmpi eq, %c16_i32, %c0_i32 : i32
    %c1_i32 = arith.constant 1 : i32
    %4 = arith.select %3, %c1_i32, %c16_i32 : i32
    %5 = vector.broadcast %4 : i32 to vector<1x256xi32>
    %6 = arith.remsi %2, %5 : vector<1x256xi32>
    %c0_i32_2 = arith.constant 0 : i32
    %7 = vector.broadcast %c0_i32_2 : i32 to vector<1x256xi32>
    %8 = arith.cmpi ne, %6, %7 : vector<1x256xi32>
    %c0_i32_3 = arith.constant 0 : i32
    %9 = vector.broadcast %c0_i32_3 : i32 to vector<1x256xi32>
    %10 = arith.cmpi slt, %6, %9 : vector<1x256xi32>
    %c0_i32_4 = arith.constant 0 : i32
    %11 = arith.cmpi slt, %4, %c0_i32_4 : i32
    %12 = vector.broadcast %11 : i1 to vector<1x256xi1>
    %13 = vector.broadcast %12 : vector<1x256xi1> to vector<1x256xi1>
    %14 = arith.xori %10, %13 : vector<1x256xi1>
    %15 = arith.andi %14, %8 : vector<1x256xi1>
    %16 = vector.broadcast %4 : i32 to vector<1x256xi32>
    %17 = arith.addi %6, %16 : vector<1x256xi32>
    %18 = arith.select %15, %17, %6 : vector<1x256xi1>, vector<1x256xi32>
    %c0_5 = arith.constant 0 : index
    %c0_6 = arith.constant 0 : index
    %19 = vector.load %arg2[%c0_5, %c0_6] : memref<4x36xf32, #tpu.memory_space<vmem>>, vector<4x36xf32>
    %c0_7 = arith.constant 0 : index
    %c0_8 = arith.constant 0 : index
    %20 = vector.load %arg3[%c0_7, %c0_8] : memref<4x1xf32, #tpu.memory_space<vmem>>, vector<4x1xf32>
    %cst = arith.constant 0.000000e+00 : f32
    %21 = vector.broadcast %cst : f32 to vector<4x128xf32>
    %c0_9 = arith.constant 0 : index
    %c0_10 = arith.constant 0 : index
    %22 = vector.load %arg7[%c0_9, %c0_10] : memref<4x512xf32, #tpu.memory_space<vmem>>, vector<4x128xf32>
    tpu.vector_store %arg7[%c0_9, %c0_10], %21 {strides = array<i32>} : memref<4x512xf32, #tpu.memory_space<vmem>>, vector<4x128xf32>,
    %c0_11 = arith.constant 0 : index
    %c384 = arith.constant 384 : index
    %23 = vector.load %arg7[%c0_11, %c384] : memref<4x512xf32, #tpu.memory_space<vmem>>, vector<4x128xf32>
    tpu.vector_store %arg7[%c0_11, %c384], %21 {strides = array<i32>} : memref<4x512xf32, #tpu.memory_space<vmem>>, vector<4x128xf32>,
    %c0_12 = arith.constant 0 : index
    %c128 = arith.constant 128 : index
    %24 = vector.load %arg7[%c0_12, %c128] : memref<4x512xf32, #tpu.memory_space<vmem>>, vector<4x256xf32>
    tpu.vector_store %arg7[%c0_12, %c128], %1 {strides = array<i32>} : memref<4x512xf32, #tpu.memory_space<vmem>>, vector<4x256xf32>,
    %c0_13 = arith.constant 0 : index
    %c111 = arith.constant 111 : index
    %25 = vector.load %arg7[%c0_13, %c111] : memref<4x512xf32, #tpu.memory_space<vmem>>, vector<4x256xf32>
    %c-1_i32 = arith.constant -1 : i32
    %26 = vector.broadcast %c-1_i32 : i32 to vector<1x256xi32>
    %27 = arith.addi %18, %26 : vector<1x256xi32>
    %c0_i32_14 = arith.constant 0 : i32
    %28 = vector.broadcast %c0_i32_14 : i32 to vector<1x256xi32>
    %29 = arith.cmpi sge, %27, %28 : vector<1x256xi32>
    %c-1_i32_15 = arith.constant -1 : i32
    %30 = vector.broadcast %c-1_i32_15 : i32 to vector<1x256xi32>
    %31 = arith.addi %18, %30 : vector<1x256xi32>
    %c16_i32_16 = arith.constant 16 : i32
    %32 = vector.broadcast %c16_i32_16 : i32 to vector<1x256xi32>
    %33 = arith.cmpi slt, %31, %32 : vector<1x256xi32>
    %34 = arith.andi %29, %33 : vector<1x256xi1>
    %cst_17 = arith.constant 0.000000e+00 : f32
    %35 = vector.shape_cast %34 : vector<1x256xi1> to vector<1x256xi1>
    %36 = vector.broadcast %35 : vector<1x256xi1> to vector<4x256xi1>
    %37 = vector.broadcast %cst_17 : f32 to vector<4x256xf32>
    %38 = arith.select %36, %25, %37 : vector<4x256xi1>, vector<4x256xf32>
    %c0_18 = arith.constant 0 : index
    %c0_19 = arith.constant 0 : index
    %39 = vector.load %arg8[%c0_18, %c0_19] : memref<36x256xf32, #tpu.memory_space<vmem>>, vector<4x256xf32>
    tpu.vector_store %arg8[%c0_18, %c0_19], %38 {strides = array<i32>} : memref<36x256xf32, #tpu.memory_space<vmem>>, vector<4x256xf32>,
    %c0_20 = arith.constant 0 : index
    %c112 = arith.constant 112 : index
    %40 = vector.load %arg7[%c0_20, %c112] : memref<4x512xf32, #tpu.memory_space<vmem>>, vector<4x256xf32>
    %c4 = arith.constant 4 : index
    %c0_21 = arith.constant 0 : index
    %41 = vector.load %arg8[%c4, %c0_21] : memref<36x256xf32, #tpu.memory_space<vmem>>, vector<4x256xf32>
    tpu.vector_store %arg8[%c4, %c0_21], %40 {strides = array<i32>} : memref<36x256xf32, #tpu.memory_space<vmem>>, vector<4x256xf32>,
    %c0_22 = arith.constant 0 : index
    %c113 = arith.constant 113 : index
    %42 = vector.load %arg7[%c0_22, %c113] : memref<4x512xf32, #tpu.memory_space<vmem>>, vector<4x256xf32>
    %c1_i32_23 = arith.constant 1 : i32
    %43 = vector.broadcast %c1_i32_23 : i32 to vector<1x256xi32>
    %44 = arith.addi %18, %43 : vector<1x256xi32>
    %c0_i32_24 = arith.constant 0 : i32
    %45 = vector.broadcast %c0_i32_24 : i32 to vector<1x256xi32>
    %46 = arith.cmpi sge, %44, %45 : vector<1x256xi32>
    %c1_i32_25 = arith.constant 1 : i32
    %47 = vector.broadcast %c1_i32_25 : i32 to vector<1x256xi32>
    %48 = arith.addi %18, %47 : vector<1x256xi32>
    %c16_i32_26 = arith.constant 16 : i32
    %49 = vector.broadcast %c16_i32_26 : i32 to vector<1x256xi32>
    %50 = arith.cmpi slt, %48, %49 : vector<1x256xi32>
    %51 = arith.andi %46, %50 : vector<1x256xi1>
    %cst_27 = arith.constant 0.000000e+00 : f32
    %52 = vector.shape_cast %51 : vector<1x256xi1> to vector<1x256xi1>
    %53 = vector.broadcast %52 : vector<1x256xi1> to vector<4x256xi1>
    %54 = vector.broadcast %cst_27 : f32 to vector<4x256xf32>
    %55 = arith.select %53, %42, %54 : vector<4x256xi1>, vector<4x256xf32>
    %c8 = arith.constant 8 : index
    %c0_28 = arith.constant 0 : index
    %56 = vector.load %arg8[%c8, %c0_28] : memref<36x256xf32, #tpu.memory_space<vmem>>, vector<4x256xf32>
    tpu.vector_store %arg8[%c8, %c0_28], %55 {strides = array<i32>} : memref<36x256xf32, #tpu.memory_space<vmem>>, vector<4x256xf32>,
    %c0_29 = arith.constant 0 : index
    %c127 = arith.constant 127 : index
    %57 = vector.load %arg7[%c0_29, %c127] : memref<4x512xf32, #tpu.memory_space<vmem>>, vector<4x256xf32>
    %c-1_i32_30 = arith.constant -1 : i32
    %58 = vector.broadcast %c-1_i32_30 : i32 to vector<1x256xi32>
    %59 = arith.addi %18, %58 : vector<1x256xi32>
    %c0_i32_31 = arith.constant 0 : i32
    %60 = vector.broadcast %c0_i32_31 : i32 to vector<1x256xi32>
    %61 = arith.cmpi sge, %59, %60 : vector<1x256xi32>
    %c-1_i32_32 = arith.constant -1 : i32
    %62 = vector.broadcast %c-1_i32_32 : i32 to vector<1x256xi32>
    %63 = arith.addi %18, %62 : vector<1x256xi32>
    %c16_i32_33 = arith.constant 16 : i32
    %64 = vector.broadcast %c16_i32_33 : i32 to vector<1x256xi32>
    %65 = arith.cmpi slt, %63, %64 : vector<1x256xi32>
    %66 = arith.andi %61, %65 : vector<1x256xi1>
    %cst_34 = arith.constant 0.000000e+00 : f32
    %67 = vector.shape_cast %66 : vector<1x256xi1> to vector<1x256xi1>
    %68 = vector.broadcast %67 : vector<1x256xi1> to vector<4x256xi1>
    %69 = vector.broadcast %cst_34 : f32 to vector<4x256xf32>
    %70 = arith.select %68, %57, %69 : vector<4x256xi1>, vector<4x256xf32>
    %c12 = arith.constant 12 : index
    %c0_35 = arith.constant 0 : index
    %71 = vector.load %arg8[%c12, %c0_35] : memref<36x256xf32, #tpu.memory_space<vmem>>, vector<4x256xf32>
    tpu.vector_store %arg8[%c12, %c0_35], %70 {strides = array<i32>} : memref<36x256xf32, #tpu.memory_space<vmem>>, vector<4x256xf32>,
    %c0_36 = arith.constant 0 : index
    %c128_37 = arith.constant 128 : index
    %72 = vector.load %arg7[%c0_36, %c128_37] : memref<4x512xf32, #tpu.memory_space<vmem>>, vector<4x256xf32>
    %c16 = arith.constant 16 : index
    %c0_38 = arith.constant 0 : index
    %73 = vector.load %arg8[%c16, %c0_38] : memref<36x256xf32, #tpu.memory_space<vmem>>, vector<4x256xf32>
    tpu.vector_store %arg8[%c16, %c0_38], %72 {strides = array<i32>} : memref<36x256xf32, #tpu.memory_space<vmem>>, vector<4x256xf32>,
    %c0_39 = arith.constant 0 : index
    %c129 = arith.constant 129 : index
    %74 = vector.load %arg7[%c0_39, %c129] : memref<4x512xf32, #tpu.memory_space<vmem>>, vector<4x256xf32>
    %c1_i32_40 = arith.constant 1 : i32
    %75 = vector.broadcast %c1_i32_40 : i32 to vector<1x256xi32>
    %76 = arith.addi %18, %75 : vector<1x256xi32>
    %c0_i32_41 = arith.constant 0 : i32
    %77 = vector.broadcast %c0_i32_41 : i32 to vector<1x256xi32>
    %78 = arith.cmpi sge, %76, %77 : vector<1x256xi32>
    %c1_i32_42 = arith.constant 1 : i32
    %79 = vector.broadcast %c1_i32_42 : i32 to vector<1x256xi32>
    %80 = arith.addi %18, %79 : vector<1x256xi32>
    %c16_i32_43 = arith.constant 16 : i32
    %81 = vector.broadcast %c16_i32_43 : i32 to vector<1x256xi32>
    %82 = arith.cmpi slt, %80, %81 : vector<1x256xi32>
    %83 = arith.andi %78, %82 : vector<1x256xi1>
    %cst_44 = arith.constant 0.000000e+00 : f32
    %84 = vector.shape_cast %83 : vector<1x256xi1> to vector<1x256xi1>
    %85 = vector.broadcast %84 : vector<1x256xi1> to vector<4x256xi1>
    %86 = vector.broadcast %cst_44 : f32 to vector<4x256xf32>
    %87 = arith.select %85, %74, %86 : vector<4x256xi1>, vector<4x256xf32>
    %c20 = arith.constant 20 : index
    %c0_45 = arith.constant 0 : index
    %88 = vector.load %arg8[%c20, %c0_45] : memref<36x256xf32, #tpu.memory_space<vmem>>, vector<4x256xf32>
    tpu.vector_store %arg8[%c20, %c0_45], %87 {strides = array<i32>} : memref<36x256xf32, #tpu.memory_space<vmem>>, vector<4x256xf32>,
    %c0_46 = arith.constant 0 : index
    %c143 = arith.constant 143 : index
    %89 = vector.load %arg7[%c0_46, %c143] : memref<4x512xf32, #tpu.memory_space<vmem>>, vector<4x256xf32>
    %c-1_i32_47 = arith.constant -1 : i32
    %90 = vector.broadcast %c-1_i32_47 : i32 to vector<1x256xi32>
    %91 = arith.addi %18, %90 : vector<1x256xi32>
    %c0_i32_48 = arith.constant 0 : i32
    %92 = vector.broadcast %c0_i32_48 : i32 to vector<1x256xi32>
    %93 = arith.cmpi sge, %91, %92 : vector<1x256xi32>
    %c-1_i32_49 = arith.constant -1 : i32
    %94 = vector.broadcast %c-1_i32_49 : i32 to vector<1x256xi32>
    %95 = arith.addi %18, %94 : vector<1x256xi32>
    %c16_i32_50 = arith.constant 16 : i32
    %96 = vector.broadcast %c16_i32_50 : i32 to vector<1x256xi32>
    %97 = arith.cmpi slt, %95, %96 : vector<1x256xi32>
    %98 = arith.andi %93, %97 : vector<1x256xi1>
    %cst_51 = arith.constant 0.000000e+00 : f32
    %99 = vector.shape_cast %98 : vector<1x256xi1> to vector<1x256xi1>
    %100 = vector.broadcast %99 : vector<1x256xi1> to vector<4x256xi1>
    %101 = vector.broadcast %cst_51 : f32 to vector<4x256xf32>
    %102 = arith.select %100, %89, %101 : vector<4x256xi1>, vector<4x256xf32>
    %c24 = arith.constant 24 : index
    %c0_52 = arith.constant 0 : index
    %103 = vector.load %arg8[%c24, %c0_52] : memref<36x256xf32, #tpu.memory_space<vmem>>, vector<4x256xf32>
    tpu.vector_store %arg8[%c24, %c0_52], %102 {strides = array<i32>} : memref<36x256xf32, #tpu.memory_space<vmem>>, vector<4x256xf32>,
    %c0_53 = arith.constant 0 : index
    %c144 = arith.constant 144 : index
    %104 = vector.load %arg7[%c0_53, %c144] : memref<4x512xf32, #tpu.memory_space<vmem>>, vector<4x256xf32>
    %c28 = arith.constant 28 : index
    %c0_54 = arith.constant 0 : index
    %105 = vector.load %arg8[%c28, %c0_54] : memref<36x256xf32, #tpu.memory_space<vmem>>, vector<4x256xf32>
    tpu.vector_store %arg8[%c28, %c0_54], %104 {strides = array<i32>} : memref<36x256xf32, #tpu.memory_space<vmem>>, vector<4x256xf32>,
    %c0_55 = arith.constant 0 : index
    %c145 = arith.constant 145 : index
    %106 = vector.load %arg7[%c0_55, %c145] : memref<4x512xf32, #tpu.memory_space<vmem>>, vector<4x256xf32>
    %c1_i32_56 = arith.constant 1 : i32
    %107 = vector.broadcast %c1_i32_56 : i32 to vector<1x256xi32>
    %108 = arith.addi %18, %107 : vector<1x256xi32>
    %c0_i32_57 = arith.constant 0 : i32
    %109 = vector.broadcast %c0_i32_57 : i32 to vector<1x256xi32>
    %110 = arith.cmpi sge, %108, %109 : vector<1x256xi32>
    %c1_i32_58 = arith.constant 1 : i32
    %111 = vector.broadcast %c1_i32_58 : i32 to vector<1x256xi32>
    %112 = arith.addi %18, %111 : vector<1x256xi32>
    %c16_i32_59 = arith.constant 16 : i32
    %113 = vector.broadcast %c16_i32_59 : i32 to vector<1x256xi32>
    %114 = arith.cmpi slt, %112, %113 : vector<1x256xi32>
    %115 = arith.andi %110, %114 : vector<1x256xi1>
    %cst_60 = arith.constant 0.000000e+00 : f32
    %116 = vector.shape_cast %115 : vector<1x256xi1> to vector<1x256xi1>
    %117 = vector.broadcast %116 : vector<1x256xi1> to vector<4x256xi1>
    %118 = vector.broadcast %cst_60 : f32 to vector<4x256xf32>
    %119 = arith.select %117, %106, %118 : vector<4x256xi1>, vector<4x256xf32>
    %c32 = arith.constant 32 : index
    %c0_61 = arith.constant 0 : index
    %120 = vector.load %arg8[%c32, %c0_61] : memref<36x256xf32, #tpu.memory_space<vmem>>, vector<4x256xf32>
    tpu.vector_store %arg8[%c32, %c0_61], %119 {strides = array<i32>} : memref<36x256xf32, #tpu.memory_space<vmem>>, vector<4x256xf32>,
    %c0_62 = arith.constant 0 : index
    %c0_63 = arith.constant 0 : index
    %121 = vector.load %arg8[%c0_62, %c0_63] : memref<36x256xf32, #tpu.memory_space<vmem>>, vector<36x256xf32>
    %cst_64 = arith.constant dense<0.000000e+00> : vector<4x256xf32>
    %122 = tpu.matmul %19, %121, %cst_64 {dimension_numbers = #tpu.dot_dimension_numbers<[1], [0], [0], [1], [0, 0, 1, 1], [], []>} : vector<4x36xf32>, vector<36x256xf32>, vector<4x256xf32> -> vector<4x256xf32>
    %123 = vector.broadcast %20 : vector<4x1xf32> to vector<4x256xf32>
    %124 = arith.addf %122, %123 : vector<4x256xf32>
    %cst_65 = arith.constant 0.000000e+00 : f32
    %125 = vector.broadcast %cst_65 : f32 to vector<4x256xf32>
    %126 = arith.maximumf %124, %125 : vector<4x256xf32>
    %c0_66 = arith.constant 0 : index
    %c0_67 = arith.constant 0 : index
    %127 = vector.load %arg4[%c0_66, %c0_67] : memref<4x36xf32, #tpu.memory_space<vmem>>, vector<4x36xf32>
    %c0_68 = arith.constant 0 : index
    %c0_69 = arith.constant 0 : index
    %128 = vector.load %arg5[%c0_68, %c0_69] : memref<4x1xf32, #tpu.memory_space<vmem>>, vector<4x1xf32>
    %cst_70 = arith.constant 0.000000e+00 : f32
    %129 = vector.broadcast %cst_70 : f32 to vector<4x128xf32>
    %c0_71 = arith.constant 0 : index
    %c0_72 = arith.constant 0 : index
    %130 = vector.load %arg9[%c0_71, %c0_72] : memref<4x512xf32, #tpu.memory_space<vmem>>, vector<4x128xf32>
    tpu.vector_store %arg9[%c0_71, %c0_72], %129 {strides = array<i32>} : memref<4x512xf32, #tpu.memory_space<vmem>>, vector<4x128xf32>,
    %c0_73 = arith.constant 0 : index
    %c384_74 = arith.constant 384 : index
    %131 = vector.load %arg9[%c0_73, %c384_74] : memref<4x512xf32, #tpu.memory_space<vmem>>, vector<4x128xf32>
    tpu.vector_store %arg9[%c0_73, %c384_74], %129 {strides = array<i32>} : memref<4x512xf32, #tpu.memory_space<vmem>>, vector<4x128xf32>,
    %c0_75 = arith.constant 0 : index
    %c128_76 = arith.constant 128 : index
    %132 = vector.load %arg9[%c0_75, %c128_76] : memref<4x512xf32, #tpu.memory_space<vmem>>, vector<4x256xf32>
    tpu.vector_store %arg9[%c0_75, %c128_76], %126 {strides = array<i32>} : memref<4x512xf32, #tpu.memory_space<vmem>>, vector<4x256xf32>,
    %c0_77 = arith.constant 0 : index
    %c111_78 = arith.constant 111 : index
    %133 = vector.load %arg9[%c0_77, %c111_78] : memref<4x512xf32, #tpu.memory_space<vmem>>, vector<4x256xf32>
    %c-1_i32_79 = arith.constant -1 : i32
    %134 = vector.broadcast %c-1_i32_79 : i32 to vector<1x256xi32>
    %135 = arith.addi %18, %134 : vector<1x256xi32>
    %c0_i32_80 = arith.constant 0 : i32
    %136 = vector.broadcast %c0_i32_80 : i32 to vector<1x256xi32>
    %137 = arith.cmpi sge, %135, %136 : vector<1x256xi32>
    %c-1_i32_81 = arith.constant -1 : i32
    %138 = vector.broadcast %c-1_i32_81 : i32 to vector<1x256xi32>
    %139 = arith.addi %18, %138 : vector<1x256xi32>
    %c16_i32_82 = arith.constant 16 : i32
    %140 = vector.broadcast %c16_i32_82 : i32 to vector<1x256xi32>
    %141 = arith.cmpi slt, %139, %140 : vector<1x256xi32>
    %142 = arith.andi %137, %141 : vector<1x256xi1>
    %cst_83 = arith.constant 0.000000e+00 : f32
    %143 = vector.shape_cast %142 : vector<1x256xi1> to vector<1x256xi1>
    %144 = vector.broadcast %143 : vector<1x256xi1> to vector<4x256xi1>
    %145 = vector.broadcast %cst_83 : f32 to vector<4x256xf32>
    %146 = arith.select %144, %133, %145 : vector<4x256xi1>, vector<4x256xf32>
    %c0_84 = arith.constant 0 : index
    %c0_85 = arith.constant 0 : index
    %147 = vector.load %arg10[%c0_84, %c0_85] : memref<36x256xf32, #tpu.memory_space<vmem>>, vector<4x256xf32>
    tpu.vector_store %arg10[%c0_84, %c0_85], %146 {strides = array<i32>} : memref<36x256xf32, #tpu.memory_space<vmem>>, vector<4x256xf32>,
    %c0_86 = arith.constant 0 : index
    %c112_87 = arith.constant 112 : index
    %148 = vector.load %arg9[%c0_86, %c112_87] : memref<4x512xf32, #tpu.memory_space<vmem>>, vector<4x256xf32>
    %c4_88 = arith.constant 4 : index
    %c0_89 = arith.constant 0 : index
    %149 = vector.load %arg10[%c4_88, %c0_89] : memref<36x256xf32, #tpu.memory_space<vmem>>, vector<4x256xf32>
    tpu.vector_store %arg10[%c4_88, %c0_89], %148 {strides = array<i32>} : memref<36x256xf32, #tpu.memory_space<vmem>>, vector<4x256xf32>,
    %c0_90 = arith.constant 0 : index
    %c113_91 = arith.constant 113 : index
    %150 = vector.load %arg9[%c0_90, %c113_91] : memref<4x512xf32, #tpu.memory_space<vmem>>, vector<4x256xf32>
    %c1_i32_92 = arith.constant 1 : i32
    %151 = vector.broadcast %c1_i32_92 : i32 to vector<1x256xi32>
    %152 = arith.addi %18, %151 : vector<1x256xi32>
    %c0_i32_93 = arith.constant 0 : i32
    %153 = vector.broadcast %c0_i32_93 : i32 to vector<1x256xi32>
    %154 = arith.cmpi sge, %152, %153 : vector<1x256xi32>
    %c1_i32_94 = arith.constant 1 : i32
    %155 = vector.broadcast %c1_i32_94 : i32 to vector<1x256xi32>
    %156 = arith.addi %18, %155 : vector<1x256xi32>
    %c16_i32_95 = arith.constant 16 : i32
    %157 = vector.broadcast %c16_i32_95 : i32 to vector<1x256xi32>
    %158 = arith.cmpi slt, %156, %157 : vector<1x256xi32>
    %159 = arith.andi %154, %158 : vector<1x256xi1>
    %cst_96 = arith.constant 0.000000e+00 : f32
    %160 = vector.shape_cast %159 : vector<1x256xi1> to vector<1x256xi1>
    %161 = vector.broadcast %160 : vector<1x256xi1> to vector<4x256xi1>
    %162 = vector.broadcast %cst_96 : f32 to vector<4x256xf32>
    %163 = arith.select %161, %150, %162 : vector<4x256xi1>, vector<4x256xf32>
    %c8_97 = arith.constant 8 : index
    %c0_98 = arith.constant 0 : index
    %164 = vector.load %arg10[%c8_97, %c0_98] : memref<36x256xf32, #tpu.memory_space<vmem>>, vector<4x256xf32>
    tpu.vector_store %arg10[%c8_97, %c0_98], %163 {strides = array<i32>} : memref<36x256xf32, #tpu.memory_space<vmem>>, vector<4x256xf32>,
    %c0_99 = arith.constant 0 : index
    %c127_100 = arith.constant 127 : index
    %165 = vector.load %arg9[%c0_99, %c127_100] : memref<4x512xf32, #tpu.memory_space<vmem>>, vector<4x256xf32>
    %c-1_i32_101 = arith.constant -1 : i32
    %166 = vector.broadcast %c-1_i32_101 : i32 to vector<1x256xi32>
    %167 = arith.addi %18, %166 : vector<1x256xi32>
    %c0_i32_102 = arith.constant 0 : i32
    %168 = vector.broadcast %c0_i32_102 : i32 to vector<1x256xi32>
    %169 = arith.cmpi sge, %167, %168 : vector<1x256xi32>
    %c-1_i32_103 = arith.constant -1 : i32
    %170 = vector.broadcast %c-1_i32_103 : i32 to vector<1x256xi32>
    %171 = arith.addi %18, %170 : vector<1x256xi32>
    %c16_i32_104 = arith.constant 16 : i32
    %172 = vector.broadcast %c16_i32_104 : i32 to vector<1x256xi32>
    %173 = arith.cmpi slt, %171, %172 : vector<1x256xi32>
    %174 = arith.andi %169, %173 : vector<1x256xi1>
    %cst_105 = arith.constant 0.000000e+00 : f32
    %175 = vector.shape_cast %174 : vector<1x256xi1> to vector<1x256xi1>
    %176 = vector.broadcast %175 : vector<1x256xi1> to vector<4x256xi1>
    %177 = vector.broadcast %cst_105 : f32 to vector<4x256xf32>
    %178 = arith.select %176, %165, %177 : vector<4x256xi1>, vector<4x256xf32>
    %c12_106 = arith.constant 12 : index
    %c0_107 = arith.constant 0 : index
    %179 = vector.load %arg10[%c12_106, %c0_107] : memref<36x256xf32, #tpu.memory_space<vmem>>, vector<4x256xf32>
    tpu.vector_store %arg10[%c12_106, %c0_107], %178 {strides = array<i32>} : memref<36x256xf32, #tpu.memory_space<vmem>>, vector<4x256xf32>,
    %c0_108 = arith.constant 0 : index
    %c128_109 = arith.constant 128 : index
    %180 = vector.load %arg9[%c0_108, %c128_109] : memref<4x512xf32, #tpu.memory_space<vmem>>, vector<4x256xf32>
    %c16_110 = arith.constant 16 : index
    %c0_111 = arith.constant 0 : index
    %181 = vector.load %arg10[%c16_110, %c0_111] : memref<36x256xf32, #tpu.memory_space<vmem>>, vector<4x256xf32>
    tpu.vector_store %arg10[%c16_110, %c0_111], %180 {strides = array<i32>} : memref<36x256xf32, #tpu.memory_space<vmem>>, vector<4x256xf32>,
    %c0_112 = arith.constant 0 : index
    %c129_113 = arith.constant 129 : index
    %182 = vector.load %arg9[%c0_112, %c129_113] : memref<4x512xf32, #tpu.memory_space<vmem>>, vector<4x256xf32>
    %c1_i32_114 = arith.constant 1 : i32
    %183 = vector.broadcast %c1_i32_114 : i32 to vector<1x256xi32>
    %184 = arith.addi %18, %183 : vector<1x256xi32>
    %c0_i32_115 = arith.constant 0 : i32
    %185 = vector.broadcast %c0_i32_115 : i32 to vector<1x256xi32>
    %186 = arith.cmpi sge, %184, %185 : vector<1x256xi32>
    %c1_i32_116 = arith.constant 1 : i32
    %187 = vector.broadcast %c1_i32_116 : i32 to vector<1x256xi32>
    %188 = arith.addi %18, %187 : vector<1x256xi32>
    %c16_i32_117 = arith.constant 16 : i32
    %189 = vector.broadcast %c16_i32_117 : i32 to vector<1x256xi32>
    %190 = arith.cmpi slt, %188, %189 : vector<1x256xi32>
    %191 = arith.andi %186, %190 : vector<1x256xi1>
    %cst_118 = arith.constant 0.000000e+00 : f32
    %192 = vector.shape_cast %191 : vector<1x256xi1> to vector<1x256xi1>
    %193 = vector.broadcast %192 : vector<1x256xi1> to vector<4x256xi1>
    %194 = vector.broadcast %cst_118 : f32 to vector<4x256xf32>
    %195 = arith.select %193, %182, %194 : vector<4x256xi1>, vector<4x256xf32>
    %c20_119 = arith.constant 20 : index
    %c0_120 = arith.constant 0 : index
    %196 = vector.load %arg10[%c20_119, %c0_120] : memref<36x256xf32, #tpu.memory_space<vmem>>, vector<4x256xf32>
    tpu.vector_store %arg10[%c20_119, %c0_120], %195 {strides = array<i32>} : memref<36x256xf32, #tpu.memory_space<vmem>>, vector<4x256xf32>,
    %c0_121 = arith.constant 0 : index
    %c143_122 = arith.constant 143 : index
    %197 = vector.load %arg9[%c0_121, %c143_122] : memref<4x512xf32, #tpu.memory_space<vmem>>, vector<4x256xf32>
    %c-1_i32_123 = arith.constant -1 : i32
    %198 = vector.broadcast %c-1_i32_123 : i32 to vector<1x256xi32>
    %199 = arith.addi %18, %198 : vector<1x256xi32>
    %c0_i32_124 = arith.constant 0 : i32
    %200 = vector.broadcast %c0_i32_124 : i32 to vector<1x256xi32>
    %201 = arith.cmpi sge, %199, %200 : vector<1x256xi32>
    %c-1_i32_125 = arith.constant -1 : i32
    %202 = vector.broadcast %c-1_i32_125 : i32 to vector<1x256xi32>
    %203 = arith.addi %18, %202 : vector<1x256xi32>
    %c16_i32_126 = arith.constant 16 : i32
    %204 = vector.broadcast %c16_i32_126 : i32 to vector<1x256xi32>
    %205 = arith.cmpi slt, %203, %204 : vector<1x256xi32>
    %206 = arith.andi %201, %205 : vector<1x256xi1>
    %cst_127 = arith.constant 0.000000e+00 : f32
    %207 = vector.shape_cast %206 : vector<1x256xi1> to vector<1x256xi1>
    %208 = vector.broadcast %207 : vector<1x256xi1> to vector<4x256xi1>
    %209 = vector.broadcast %cst_127 : f32 to vector<4x256xf32>
    %210 = arith.select %208, %197, %209 : vector<4x256xi1>, vector<4x256xf32>
    %c24_128 = arith.constant 24 : index
    %c0_129 = arith.constant 0 : index
    %211 = vector.load %arg10[%c24_128, %c0_129] : memref<36x256xf32, #tpu.memory_space<vmem>>, vector<4x256xf32>
    tpu.vector_store %arg10[%c24_128, %c0_129], %210 {strides = array<i32>} : memref<36x256xf32, #tpu.memory_space<vmem>>, vector<4x256xf32>,
    %c0_130 = arith.constant 0 : index
    %c144_131 = arith.constant 144 : index
    %212 = vector.load %arg9[%c0_130, %c144_131] : memref<4x512xf32, #tpu.memory_space<vmem>>, vector<4x256xf32>
    %c28_132 = arith.constant 28 : index
    %c0_133 = arith.constant 0 : index
    %213 = vector.load %arg10[%c28_132, %c0_133] : memref<36x256xf32, #tpu.memory_space<vmem>>, vector<4x256xf32>
    tpu.vector_store %arg10[%c28_132, %c0_133], %212 {strides = array<i32>} : memref<36x256xf32, #tpu.memory_space<vmem>>, vector<4x256xf32>,
    %c0_134 = arith.constant 0 : index
    %c145_135 = arith.constant 145 : index
    %214 = vector.load %arg9[%c0_134, %c145_135] : memref<4x512xf32, #tpu.memory_space<vmem>>, vector<4x256xf32>
    %c1_i32_136 = arith.constant 1 : i32
    %215 = vector.broadcast %c1_i32_136 : i32 to vector<1x256xi32>
    %216 = arith.addi %18, %215 : vector<1x256xi32>
    %c0_i32_137 = arith.constant 0 : i32
    %217 = vector.broadcast %c0_i32_137 : i32 to vector<1x256xi32>
    %218 = arith.cmpi sge, %216, %217 : vector<1x256xi32>
    %c1_i32_138 = arith.constant 1 : i32
    %219 = vector.broadcast %c1_i32_138 : i32 to vector<1x256xi32>
    %220 = arith.addi %18, %219 : vector<1x256xi32>
    %c16_i32_139 = arith.constant 16 : i32
    %221 = vector.broadcast %c16_i32_139 : i32 to vector<1x256xi32>
    %222 = arith.cmpi slt, %220, %221 : vector<1x256xi32>
    %223 = arith.andi %218, %222 : vector<1x256xi1>
    %cst_140 = arith.constant 0.000000e+00 : f32
    %224 = vector.shape_cast %223 : vector<1x256xi1> to vector<1x256xi1>
    %225 = vector.broadcast %224 : vector<1x256xi1> to vector<4x256xi1>
    %226 = vector.broadcast %cst_140 : f32 to vector<4x256xf32>
    %227 = arith.select %225, %214, %226 : vector<4x256xi1>, vector<4x256xf32>
    %c32_141 = arith.constant 32 : index
    %c0_142 = arith.constant 0 : index
    %228 = vector.load %arg10[%c32_141, %c0_142] : memref<36x256xf32, #tpu.memory_space<vmem>>, vector<4x256xf32>
    tpu.vector_store %arg10[%c32_141, %c0_142], %227 {strides = array<i32>} : memref<36x256xf32, #tpu.memory_space<vmem>>, vector<4x256xf32>,
    %c0_143 = arith.constant 0 : index
    %c0_144 = arith.constant 0 : index
    %229 = vector.load %arg10[%c0_143, %c0_144] : memref<36x256xf32, #tpu.memory_space<vmem>>, vector<36x256xf32>
    %cst_145 = arith.constant dense<0.000000e+00> : vector<4x256xf32>
    %230 = tpu.matmul %127, %229, %cst_145 {dimension_numbers = #tpu.dot_dimension_numbers<[1], [0], [0], [1], [0, 0, 1, 1], [], []>} : vector<4x36xf32>, vector<36x256xf32>, vector<4x256xf32> -> vector<4x256xf32>
    %231 = vector.broadcast %128 : vector<4x1xf32> to vector<4x256xf32>
    %232 = arith.addf %230, %231 : vector<4x256xf32>
    %233 = arith.addf %232, %1 : vector<4x256xf32>
    %cst_146 = arith.constant 0.000000e+00 : f32
    %234 = vector.broadcast %cst_146 : f32 to vector<4x256xf32>
    %235 = arith.maximumf %233, %234 : vector<4x256xf32>
    %c0_147 = arith.constant 0 : index
    %c0_148 = arith.constant 0 : index
    %c0_149 = arith.constant 0 : index
    %236 = vector.load %arg6[%c0_147, %c0_148, %c0_149] : memref<1x4x256xf32, #tpu.memory_space<vmem>>, vector<1x4x256xf32>
    %237 = vector.shape_cast %236 : vector<1x4x256xf32> to vector<4x256xf32>
    %238 = vector.shape_cast %235 : vector<4x256xf32> to vector<1x4x256xf32>
    tpu.vector_store %arg6[%c0_147, %c0_148, %c0_149], %238 {strides = array<i32>} : memref<1x4x256xf32, #tpu.memory_space<vmem>>, vector<1x4x256xf32>,
    return
  }
  func.func @transform_0(%arg0: i32) -> (i32, i32, i32) {
    %c0_i32 = arith.constant 0 : i32
    %c0_i32_0 = arith.constant 0 : i32
    %c0_i32_1 = arith.constant 0 : i32
    return %arg0, %c0_i32, %c0_i32_0 : i32, i32, i32
  }
  func.func @transform_1(%arg0: i32) -> (i32, i32) {
    %c0_i32 = arith.constant 0 : i32
    %c0_i32_0 = arith.constant 0 : i32
    %c0_i32_1 = arith.constant 0 : i32
    return %c0_i32, %c0_i32_0 : i32, i32
  }
  func.func @transform_2(%arg0: i32) -> (i32, i32) {
    %c0_i32 = arith.constant 0 : i32
    %c0_i32_0 = arith.constant 0 : i32
    %c0_i32_1 = arith.constant 0 : i32
    return %c0_i32, %c0_i32_0 : i32, i32
  }
  func.func @transform_3(%arg0: i32) -> (i32, i32) {
    %c0_i32 = arith.constant 0 : i32
    %c0_i32_0 = arith.constant 0 : i32
    %c0_i32_1 = arith.constant 0 : i32
    return %c0_i32, %c0_i32_0 : i32, i32
  }
  func.func @transform_4(%arg0: i32) -> (i32, i32) {
    %c0_i32 = arith.constant 0 : i32
    %c0_i32_0 = arith.constant 0 : i32
    %c0_i32_1 = arith.constant 0 : i32
    return %c0_i32, %c0_i32_0 : i32, i32
  }
  func.func @transform_5(%arg0: i32) -> (i32, i32, i32) {
    %c0_i32 = arith.constant 0 : i32
    %c0_i32_0 = arith.constant 0 : i32
    %c0_i32_1 = arith.constant 0 : i32
    return %arg0, %c0_i32, %c0_i32_0 : i32, i32, i32
  }
}

</mosaic_0001>

<bundles_post_ra>
// kernel: basic_block_forward.1
= control target key start
LH: loop header
LB: loop body
LE: loop exit
PB: predicated region body
PF: predicated region fallthrough
CT: control target
= control target key end

     0   :  { %s1010_s18 = smov 0   ;;  %s1212_s0 = inlined_call_operand.vmem [shape: f32[2,4,256], index: 0, kind: input, shape index: {}]   ;;  %s1213_s1 = inlined_call_operand.vmem [shape: f32[4,36], index: 1, kind: input, shape index: {}]   ;;  %s1214_s2 = inlined_call_operand.vmem [shape: f32[4,1], index: 2, kind: input, shape index: {}]   ;;  %s1215_s3 = inlined_call_operand.vmem [shape: f32[4,36], index: 3, kind: input, shape index: {}]   ;;  %s1216_s4 = inlined_call_operand.vmem [shape: f32[4,1], index: 4, kind: input, shape index: {}]   ;;  %s1217_s5 = inlined_call_operand.vmem [shape: f32[2,4,256], index: 5, kind: output, shape index: {}]  }
   0x1 LB: > { %s896_s19 = sadd.s32 4294967295, %s968_s18   ;;  %p900_p0 = scmp.ge.s32.totalorder %s968_s18, 1  ;;  %s968_s18 = sphi %s1010_s18, %s15_s18  }
   0x2   : > { %p187_p1 = scmp.lt.s32.totalorder %s968_s18, 3 }
   0x4   : > { %p188_p2 = pnand %p900_p0, %p187_p1 }
   0x5   : > { %p215_p3 = scmp.lt.s32.totalorder (!%p188_p2), %s896_s19, 1  ;;  %v970_v0 = vmov (!%p188_p2), 0.0   ;;  %s971_s24 = smov (!%p188_p2), 1   ;;  %v979_v15 = vmov (!%p188_p2), 0   ;;  %v254_v16 = vld [vmem:[%s1214_s2] sm:$0xf] (!%p188_p2)  ;;  %v226_v17 = vlaneseq (!%p188_p2) }
   0x6   : > { %191 = sbr.rel (%p188_p2) target bundleno = 811 (0x32b), region = 40  ;;  %255 = vst [vmem:[#allocation2] sm:$0xf] (!%p188_p2), %v970_v0  ;;  %256 = vst [vmem:[#allocation2 + $0xc] sm:$0xf] (!%p188_p2), %v970_v0  ;;  %548 = vmatprep.mubr.f32.mxu0 (!%p188_p2), %v970_v0  ;;  %822 = vmatprep.mubr.f32.mxu1 (!%p188_p2), %v970_v0  ;;  %s972_s25 = smov (!%p188_p2), 17  }
   0x7   : > { %559 = vst [vmem:[#allocation4] sm:$0xf] (!%p188_p2), %v970_v0  ;;  %560 = vst [vmem:[#allocation4 + $0xc] sm:$0xf] (!%p188_p2), %v970_v0  ;;  %s973_s26 = smov (!%p188_p2), 15   ;;  %s974_s27 = smov (!%p188_p2), 16   ;;  %949 = vset.pattern.permute.xlu0 (!%p188_p2), %v979_v15 }
   0x8   : > { %s975_s28 = smov (!%p188_p2), 127   ;;  %s976_s29 = smov (!%p188_p2), 113   ;;  %v227_v18 = vand.u32 (!%p188_p2), 127, %v226_v17  ;;  %vm281_vm0 = vcmask (!%p188_p2), 138240   ;;  %vm332_vm3 = vcmask (!%p188_p2), 121856   ;;  %vm352_vm5 = vcmask (!%p188_p2), 7168  }
   0x9   : > { %s977_s30 = smov (!%p188_p2), 112   ;;  %s978_s6 = smov (!%p188_p2), 111   ;;  %vm302_vm6 = vcmask (!%p188_p2), 130048   ;;  %vm384_vm8 = vcmask (!%p188_p2), 1039360   ;;  %vm410_vm9 = vcmask (!%p188_p2), 924672   ;;  %vm431_vm10 = vcmask (!%p188_p2), 916480  }
   0xa   : > { %v228_v19 = vadd.s32 (!%p188_p2), 128, %v227_v18  ;;  %v233_v20 = vand.u32 (!%p188_p2), 15, %v227_v18  ;;  %vm449_vm11 = vcmask (!%p188_p2), 908288   ;;  %vm477_vm12 = vcmask (!%p188_p2), 1043456  }
   0xb   : > { %vm473_vm13 = vcmask (!%p188_p2), 293888  }
   0xc   : > { %v240_v21 = vand.u32 (!%p188_p2), 15, %v228_v19  ;;  %v1071_v24 = vadd.s32 (!%p188_p2), 4294967295, %v233_v20  ;;  %v1089_v39 = vadd.s32 (!%p188_p2), 1, %v233_v20 }
   0xd   : > { %s1219_s19 = smov (!%p215_p3, %s896_s19), 1  ;;  %v374_v10 = vld [vmem:[#allocation2 + $0xc] sm:$0xf] }
   0xe   : > { %s913_s20 = sshll.u32 %s1219_s19, 3  ;;  %v400_v11 = vld [vmem:[#allocation2 + $0xc] sm:$0xf]  ;;  %v1073_v25 = vadd.s32 4294967295, %v240_v21  ;;  %vm262_vm1 = vcmp.ge.s32.totalorder %v1071_v24, 0  ;;  %v1077_v28 = vadd.s32 1, %v240_v21 }
   0xf   : > { %s219_s23 = scalar_lea.vmem %s1212_s0, %s913_s20  ;;  %v955_v12 = vld [vmem:[#allocation2 + $0xc] ss:$0 sps:$4 sm:$0xff]   ;;  %vm315_vm7 = vcmp.lt.s32.totalorder %v1089_v39, 16  ;;  %s224_s17 = scalar_lea.vmem %s1217_s5, %s913_s20 }
  0x10   : > { %v1026_v1 = vld [vmem:[%s219_s23] sm:$0xff]  ;;  %v439_v14 = vld [vmem:[#allocation2 + $0xc] sm:$0xf]  ;;  %vm263_vm2 = vcmp.ge.s32.totalorder %v1073_v25, 0  ;;  %vm316_vm4 = vcmp.lt.s32.totalorder %v1077_v28, 16 }
  0x11   : > { %257 = vst [vmem:[#allocation2 + $0x4] sm:$0xff] %v1026_v1  ;;  %v1031_v2 = vcombine.high %v1026_v1, %v1026_v1  ;;  %371 = vst [vmem:[#allocation3 + $0x20] sm:$0xf] %v1026_v1  ;;  %v423_v13 = vcombine.low %v1026_v1, %v1026_v1 }
  0x13   : > { %372 = vst [vmem:[#allocation3 + $0x28] sm:$0xf] %v1031_v2 }
  0x18   : > { %v342_v3 = vld [vmem:[#allocation2 + $0x8] sm:$0xf]  ;;  %v341_v4 = vld [vmem:[#allocation2] sm:$0xff] }
  0x19   : > { %350 = vrot.lane.b32.xlu0 %v342_v3, %s971_s24  ;;  %346 = vrot.lane.b32.xlu1 %v341_v4, %s971_s24  ;;  %v259_v5 = vld [vmem:[#allocation2 + $0x8] sm:$0xf]  ;;  %v345_v6 = vcombine.high %v341_v4, %v341_v4  ;;  %v294_v9 = vcombine.low %v341_v4, %v341_v4 }
  0x1a   : > { %v310_v7 = vld [vmem:[#allocation2 + $0x8] sm:$0xf] }
  0x1b   : > { %v952_v8 = vld [vmem:[#allocation2 + $0x8] ss:$0 sps:$4 sm:$0xff]  }
  0x1d   : > { %279 = vrot.lane.b32.xlu0 %v259_v5, %s972_s25  ;;  %275 = vrot.lane.b32.xlu1 %v341_v4, %s972_s25 }
  0x21   : > { %330 = vrot.lane.b32.xlu0 %v310_v7, %s973_s26  ;;  %277 = vrot.lane.b32.xlu1 %v345_v6, %s972_s25 }
  0x25   : > { %298 = vrot.lane.b32.xlu0 %v341_v4, %s974_s27  ;;  %328 = vrot.lane.b32.xlu1 %v345_v6, %s973_s26 }
  0x29   : > { %348 = vrot.lane.b32.xlu0 %v345_v6, %s971_s24  ;;  %300 = vrot.lane.b32.xlu1 %v952_v8, %s974_s27 }
  0x2d   : > { %326 = vrot.lane.b32.xlu0 %v341_v4, %s973_s26  ;;  %296 = vrot.lane.b32.xlu1 %v294_v9, %s974_s27 }
  0x31   : > { %380 = vrot.lane.b32.xlu0 %v1031_v2, %s975_s28  ;;  %382 = vrot.lane.b32.xlu1 %v374_v10, %s975_s28 }
  0x35   : > { %378 = vrot.lane.b32.xlu0 %v1026_v1, %s975_s28  ;;  %406 = vrot.lane.b32.xlu1 %v1031_v2, %s976_s29 }
  0x39   : > { %408 = vrot.lane.b32.xlu0 %v400_v11, %s976_s29  ;;  %404 = vrot.lane.b32.xlu1 %v1026_v1, %s976_s29 }
  0x3d   : > { %427 = vrot.lane.b32.xlu0 %v1026_v1, %s977_s30  ;;  %429 = vrot.lane.b32.xlu1 %v955_v12, %s977_s30 }
  0x41   : > { %425 = vrot.lane.b32.xlu0 %v423_v13, %s977_s30  ;;  %445 = vrot.lane.b32.xlu1 %v1031_v2, %s978_s6 }
  0x45   : > { %447 = vrot.lane.b32.xlu0 %v439_v14, %s978_s6  ;;  %443 = vrot.lane.b32.xlu1 %v1026_v1, %s978_s6 }
  0x49   : > { %470 = vperm.xlu0 %949, %v254_v16  }
  0x8b   : > { %v351_v22 = vpop.permute.xlu0 %350  ;;  %v347_v23 = vpop.permute.xlu1 %346 }
  0x8f   : > { %v280_v26 = vpop.permute.xlu0 %279  ;;  %v276_v27 = vpop.permute.xlu1 %275 }
  0x93   : > { %v331_v29 = vpop.permute.xlu0 %330  ;;  %v278_v30 = vpop.permute.xlu1 %277 }
  0x94   : > { %v282_v31 = vsel %vm281_vm0, %v276_v27, %v278_v30  ;;  %v283_v32 = vsel %vm281_vm0, %v278_v30, %v280_v26 }
  0x95   : > { %v286_v33 = vsel %vm262_vm1, %v282_v31, 0.0  ;;  %v287_v34 = vsel %vm263_vm2, %v283_v32, 0.0 }
  0x96   : > { %288 = vst [vmem:[#allocation3] sm:$0xf] %v286_v33  ;;  %289 = vst [vmem:[#allocation3 + $0x8] sm:$0xf] %v287_v34 }
  0x97   : > { %v299_v35 = vpop.permute.xlu0 %298  ;;  %v329_v36 = vpop.permute.xlu1 %328 }
  0x98   : > { %v334_v37 = vsel %vm332_vm3, %v329_v36, %v331_v29 }
  0x99   : > { %v338_v38 = vsel %vm316_vm4, %v334_v37, 0.0 }
  0x9a   : > { %340 = vst [vmem:[#allocation3 + $0x18] sm:$0xf] %v338_v38  ;;  %v654_v38 = vld [vmem:[#allocation4 + $0xc] sm:$0xf] }
  0x9b   : > { %v349_v40 = vpop.permute.xlu0 %348  ;;  %v301_v41 = vpop.permute.xlu1 %300  ;;  %662 = vrot.lane.b32.xlu1 %v654_v38, %s975_s28 }
  0x9c   : > { %v353_v42 = vsel %vm352_vm5, %v347_v23, %v349_v40  ;;  %v354_v43 = vsel %vm352_vm5, %v349_v40, %v351_v22  ;;  %v304_v44 = vsel %vm302_vm6, %v299_v35, %v301_v41  ;;  %v679_v40 = vld [vmem:[#allocation4 + $0xc] sm:$0xf] }
  0x9d   : > { %v357_v45 = vsel %vm262_vm1, %v353_v42, 0.0  ;;  %v358_v46 = vsel %vm263_vm2, %v354_v43, 0.0  ;;  %308 = vst [vmem:[#allocation3 + $0x8] sm:$0xf0] %v304_v44  ;;  %v956_v41 = vld [vmem:[#allocation4 + $0xc] ss:$0 sps:$4 sm:$0xff]   ;;  %687 = vrot.lane.b32.xlu0 %v679_v40, %s976_s29 }
  0x9e   : > { %v361_v47 = vrot.slane %v357_v45, 4  ;;  %v362_v48 = vrot.slane %v358_v46, 4 }
  0x9f   : > { %v327_v49 = vpop.permute.xlu0 %326  ;;  %v297_v50 = vpop.permute.xlu1 %296  ;;  %707 = vrot.lane.b32.xlu1 %v956_v41, %s977_s30 }
  0xa0   : > { %365 = vst [vmem:[#allocation3 + $0x10] sm:$0xf0] %v361_v47  ;;  %366 = vst [vmem:[#allocation3 + $0x18] sm:$0xf0] %v362_v48  ;;  %v333_v51 = vsel %vm332_vm3, %v327_v49, %v329_v36  ;;  %v303_v52 = vsel %vm302_vm6, %v297_v50, %v299_v35  ;;  %v253_v35 = vld [vmem:[%s1213_s1] sm:$0xf] }
  0xa1   : > { %v337_v53 = vsel %vm315_vm7, %v333_v51, 0.0  ;;  %307 = vst [vmem:[#allocation3] sm:$0xf0] %v303_v52 }
  0xa2   : > { %339 = vst [vmem:[#allocation3 + $0x10] sm:$0xf] %v337_v53 }
  0xa3   : > { %v381_v54 = vpop.permute.xlu0 %380  ;;  %v383_v55 = vpop.permute.xlu1 %382 }
  0xa4   : > { %v386_v56 = vsel %vm384_vm8, %v381_v54, %v383_v55  ;;  %v459_v61 = vld [vmem:[#allocation3 + $0x8] sm:$0xff] }
  0xa5   : > { %v390_v57 = vsel %vm316_vm4, %v386_v56, 0.0 }
  0xa6   : > { %v394_v58 = vrot.slane %v390_v57, 4 }
  0xa7   : > { %v379_v59 = vpop.permute.xlu0 %378  ;;  %v407_v60 = vpop.permute.xlu1 %406  ;;  %v461_v62 = vld [vmem:[#allocation3 + $0x18] sm:$0xff] }
  0xa8   : > { %398 = vst [vmem:[#allocation3 + $0x28] sm:$0xf0] %v394_v58  ;;  %v385_v63 = vsel %vm384_vm8, %v379_v59, %v381_v54  ;;  %v915_v0 = vpack.c.bf16 %v461_v62, %v459_v61  ;;  %v458_v3 = vld [vmem:[#allocation3] sm:$0xff]  ;;  %v716_v59 = vld [vmem:[#allocation4 + $0xc] sm:$0xf] }
  0xa9   : > { %v389_v4 = vsel %vm315_vm7, %v385_v63, 0.0  ;;  %v460_v5 = vld [vmem:[#allocation3 + $0x10] sm:$0xff] }
  0xaa   : > { %v393_v6 = vrot.slane %v389_v4, 4  ;;  %916 = vmatprep.subr.bf16.mxu0 %v915_v0  ;;  %v917_v7 = vpack.c.bf16 %v460_v5, %v458_v3 }
  0xab   : > { %v409_v8 = vpop.permute.xlu0 %408  ;;  %v405_v9 = vpop.permute.xlu1 %404 }
  0xac   : > { %397 = vst [vmem:[#allocation3 + $0x20] sm:$0xf0] %v393_v6  ;;  %v412_v10 = vsel %vm410_vm9, %v407_v60, %v409_v8  ;;  %v411_v11 = vsel %vm410_vm9, %v405_v9, %v407_v60  ;;  %918 = vmatpush1.bf16.msra.mxu0 %v917_v7  ;;  %v558_v60 = vld [vmem:[%s1216_s4] sm:$0xf] }
  0xad   : > { %v416_v12 = vsel %vm263_vm2, %v412_v10, 0.0  ;;  %v415_v13 = vsel %vm262_vm1, %v411_v11, 0.0 }
  0xae   : > { %418 = vst [vmem:[#allocation3 + $0x38] sm:$0xf] %v416_v12  ;;  %417 = vst [vmem:[#allocation3 + $0x30] sm:$0xf] %v415_v13 }
  0xaf   : > { %v428_v14 = vpop.permute.xlu0 %427  ;;  %v430_v15 = vpop.permute.xlu1 %429  ;;  %v463_v26 = vld [vmem:[#allocation3 + $0x28] sm:$0xff] }
  0xb0   : > { %v433_v16 = vsel %vm431_vm10, %v428_v14, %v430_v15 }
  0xb1   : > { %437 = vst [vmem:[#allocation3 + $0x38] sm:$0xf0] %v433_v16 }
  0xb3   : > { %v426_v17 = vpop.permute.xlu0 %425  ;;  %v446_v18 = vpop.permute.xlu1 %445  ;;  %v462_v32 = vld [vmem:[#allocation3 + $0x20] sm:$0xff] }
  0xb4   : > { %v432_v19 = vsel %vm431_vm10, %v426_v17, %v428_v14 }
  0xb5   : > { %436 = vst [vmem:[#allocation3 + $0x30] sm:$0xf0] %v432_v19 }
  0xb7   : > { %v448_v20 = vpop.permute.xlu0 %447  ;;  %v444_v21 = vpop.permute.xlu1 %443 }
  0xb8   : > { %v451_v22 = vsel %vm449_vm11, %v446_v18, %v448_v20  ;;  %v450_v23 = vsel %vm449_vm11, %v444_v21, %v446_v18  ;;  %v465_v27 = vld [vmem:[#allocation3 + $0x38] sm:$0xff] }
  0xb9   : > { %v455_v29 = vsel %vm316_vm4, %v451_v22, 0.0  ;;  %v454_v30 = vsel %vm315_vm7, %v450_v23, 0.0  ;;  %v919_v31 = vpack.c.bf16 %v465_v27, %v463_v26 }
  0xba   : > { %457 = vst [vmem:[#allocation3 + $0x48] sm:$0xf] %v455_v29  ;;  %456 = vst [vmem:[#allocation3 + $0x40] sm:$0xf] %v454_v30 }
  0xbb   : > { %920 = vmatprep.subr.bf16.mxu0 %v919_v31 }
  0xbc   : > { %v464_v33 = vld [vmem:[#allocation3 + $0x30] sm:$0xff] }
  0xbd   : > { %v921_v34 = vpack.c.bf16 %v464_v33, %v462_v32 }
  0xbf   : > { %922 = vmatpush1.bf16.msra.mxu0 %v921_v34 }
  0xc1   : > { %v467_v36 = vld [vmem:[#allocation3 + $0x48] sm:$0xf]  ;;  %v466_v37 = vld [vmem:[#allocation3 + $0x40] sm:$0xf] }
  0xc2   : > { %905 = vmatprep.subr.msk.mxu0 %vm477_vm12, %v467_v36 }
  0xc3   : > { %906 = vmatpush1.msk.msra.mxu0 %vm477_vm12, %v466_v37 }
  0xc4   : > { %907 = vmatmul.mubr.msk.f32.vlgmr.msra.gmra.mrb[0].mxu0 %vm473_vm13, %v253_v35 }
  0xc8   : > { %v471_v42 = vpop.permute.xlu0 %470 }
 0x10d   : > { %v663_v61 = vpop.permute.xlu1 %662 }
 0x10f   : > { %v688_v62 = vpop.permute.xlu0 %687 }
 0x111   : > { %v708_v63 = vpop.permute.xlu1 %707 }
 0x197   : > { %v550_v43 = vpop.f32.mrb[0].mxu0 }
 0x198   : > { %v551_v44 = vadd.f32 %v550_v43, %v471_v42  ;;  %v552_v45 = vpop.f32.mrb[1].mxu0 }
 0x199   : > { %v553_v46 = vadd.f32 %v552_v45, %v471_v42 }
 0x19a   : > { %v555_v47 = vmax.f32 %v551_v44, 0.0 }
 0x19b   : > { %v556_v48 = vmax.f32 %v553_v46, 0.0 }
 0x19c   : > { %v961_v58 = vcombine.low %v555_v47, %v555_v47 }
 0x19d   : > { %v563_v49 = vcombine.low %v555_v47, %v556_v48  ;;  %v960_v50 = vcombine.low %v556_v48, %v556_v48 }
 0x19f   : > { %565 = vst [vmem:[#allocation4 + $0x4] sm:$0xff] %v563_v49  ;;  %651 = vst [vmem:[#allocation5 + $0x20] sm:$0xf] %v563_v49 }
 0x1a0   : > { %652 = vst [vmem:[#allocation5 + $0x28] sm:$0xf] %v960_v50 }
 0x1a6   : > { %v623_v51 = vld [vmem:[#allocation4 + $0x8] sm:$0xf]  ;;  %v622_v52 = vld [vmem:[#allocation4] sm:$0xff] }
 0x1a7   : > { %631 = vrot.lane.b32.xlu1 %v623_v51, %s971_s24  ;;  %627 = vrot.lane.b32.xlu0 %v622_v52, %s971_s24  ;;  %v567_v53 = vld [vmem:[#allocation4 + $0x8] sm:$0xf]  ;;  %v626_v55 = vcombine.high %v622_v52, %v622_v52  ;;  %v589_v57 = vcombine.low %v622_v52, %v622_v52 }
 0x1a8   : > { %v604_v54 = vld [vmem:[#allocation4 + $0x8] sm:$0xf] }
 0x1a9   : > { %v959_v56 = vld [vmem:[#allocation4 + $0x8] ss:$0 sps:$4 sm:$0xff]  }
 0x1ab   : > { %575 = vrot.lane.b32.xlu0 %v567_v53, %s972_s25  ;;  %571 = vrot.lane.b32.xlu1 %v622_v52, %s972_s25 }
 0x1af   : > { %612 = vrot.lane.b32.xlu0 %v604_v54, %s973_s26  ;;  %683 = vrot.lane.b32.xlu1 %v563_v49, %s976_s29 }
 0x1b3   : > { %593 = vrot.lane.b32.xlu0 %v622_v52, %s974_s27  ;;  %629 = vrot.lane.b32.xlu1 %v626_v55, %s971_s24 }
 0x1b7   : > { %608 = vrot.lane.b32.xlu0 %v622_v52, %s973_s26  ;;  %573 = vrot.lane.b32.xlu1 %v626_v55, %s972_s25 }
 0x1bb   : > { %658 = vrot.lane.b32.xlu0 %v563_v49, %s975_s28  ;;  %610 = vrot.lane.b32.xlu1 %v626_v55, %s973_s26 }
 0x1bf   : > { %705 = vrot.lane.b32.xlu0 %v563_v49, %s977_s30  ;;  %595 = vrot.lane.b32.xlu1 %v959_v56, %s974_s27 }
 0x1c3   : > { %660 = vrot.lane.b32.xlu0 %v960_v50, %s975_s28  ;;  %591 = vrot.lane.b32.xlu1 %v589_v57, %s974_s27 }
 0x1c7   : > { %703 = vrot.lane.b32.xlu0 %v961_v58, %s977_s30  ;;  %685 = vrot.lane.b32.xlu1 %v960_v50, %s976_s29 }
 0x1cb   : > { %724 = vrot.lane.b32.xlu0 %v716_v59, %s978_s6  ;;  %722 = vrot.lane.b32.xlu1 %v960_v50, %s978_s6 }
 0x1cf   : > { %746 = vperm.xlu0 %949, %v558_v60   ;;  %720 = vrot.lane.b32.xlu1 %v563_v49, %s978_s6 }
 0x219   : > { %v628_v0 = vpop.permute.xlu0 %627  ;;  %v632_v3 = vpop.permute.xlu1 %631 }
 0x21d   : > { %v576_v4 = vpop.permute.xlu0 %575  ;;  %v572_v5 = vpop.permute.xlu1 %571 }
 0x221   : > { %v613_v6 = vpop.permute.xlu0 %612  ;;  %v684_v7 = vpop.permute.xlu1 %683 }
 0x225   : > { %v594_v8 = vpop.permute.xlu0 %593  ;;  %v630_v9 = vpop.permute.xlu1 %629 }
 0x226   : > { %v633_v10 = vsel %vm352_vm5, %v628_v0, %v630_v9  ;;  %v634_v11 = vsel %vm352_vm5, %v630_v9, %v632_v3 }
 0x227   : > { %v637_v12 = vsel %vm262_vm1, %v633_v10, 0.0  ;;  %v638_v13 = vsel %vm263_vm2, %v634_v11, 0.0 }
 0x228   : > { %v641_v14 = vrot.slane %v637_v12, 4  ;;  %v642_v15 = vrot.slane %v638_v13, 4 }
 0x229   : > { %v609_v16 = vpop.permute.xlu0 %608  ;;  %v574_v17 = vpop.permute.xlu1 %573 }
 0x22a   : > { %645 = vst [vmem:[#allocation5 + $0x10] sm:$0xf0] %v641_v14  ;;  %646 = vst [vmem:[#allocation5 + $0x18] sm:$0xf0] %v642_v15  ;;  %v577_v18 = vsel %vm281_vm0, %v572_v5, %v574_v17  ;;  %v578_v19 = vsel %vm281_vm0, %v574_v17, %v576_v4 }
 0x22b   : > { %v581_v20 = vsel %vm262_vm1, %v577_v18, 0.0  ;;  %v582_v21 = vsel %vm263_vm2, %v578_v19, 0.0 }
 0x22c   : > { %583 = vst [vmem:[#allocation5] sm:$0xf] %v581_v20  ;;  %584 = vst [vmem:[#allocation5 + $0x8] sm:$0xf] %v582_v21 }
 0x22d   : > { %v659_v22 = vpop.permute.xlu0 %658  ;;  %v611_v23 = vpop.permute.xlu1 %610 }
 0x22e   : > { %v614_v26 = vsel %vm332_vm3, %v609_v16, %v611_v23  ;;  %v615_v27 = vsel %vm332_vm3, %v611_v23, %v613_v6 }
 0x22f   : > { %v618_v29 = vsel %vm315_vm7, %v614_v26, 0.0  ;;  %v619_v30 = vsel %vm316_vm4, %v615_v27, 0.0 }
 0x230   : > { %620 = vst [vmem:[#allocation5 + $0x10] sm:$0xf] %v618_v29  ;;  %621 = vst [vmem:[#allocation5 + $0x18] sm:$0xf] %v619_v30 }
 0x231   : > { %v706_v31 = vpop.permute.xlu0 %705  ;;  %v596_v32 = vpop.permute.xlu1 %595 }
 0x232   : > { %v710_v33 = vsel %vm431_vm10, %v706_v31, %v708_v63  ;;  %v598_v34 = vsel %vm302_vm6, %v594_v8, %v596_v32 }
 0x233   : > { %714 = vst [vmem:[#allocation5 + $0x38] sm:$0xf0] %v710_v33  ;;  %602 = vst [vmem:[#allocation5 + $0x8] sm:$0xf0] %v598_v34 }
 0x235   : > { %v661_v35 = vpop.permute.xlu0 %660  ;;  %v592_v36 = vpop.permute.xlu1 %591 }
 0x236   : > { %v664_v37 = vsel %vm384_vm8, %v659_v22, %v661_v35  ;;  %v665_v38 = vsel %vm384_vm8, %v661_v35, %v663_v61  ;;  %v597_v40 = vsel %vm302_vm6, %v592_v36, %v594_v8 }
 0x237   : > { %v668_v41 = vsel %vm315_vm7, %v664_v37, 0.0  ;;  %v669_v42 = vsel %vm316_vm4, %v665_v38, 0.0  ;;  %601 = vst [vmem:[#allocation5] sm:$0xf0] %v597_v40  ;;  %v737_v51 = vld [vmem:[#allocation5 + $0x18] sm:$0xff]  ;;  %v736_v59 = vld [vmem:[#allocation5 + $0x10] sm:$0xff] }
 0x238   : > { %v672_v43 = vrot.slane %v668_v41, 4  ;;  %v673_v44 = vrot.slane %v669_v42, 4 }
 0x239   : > { %v704_v45 = vpop.permute.xlu0 %703  ;;  %v686_v46 = vpop.permute.xlu1 %685 }
 0x23a   : > { %676 = vst [vmem:[#allocation5 + $0x20] sm:$0xf0] %v672_v43  ;;  %677 = vst [vmem:[#allocation5 + $0x28] sm:$0xf0] %v673_v44  ;;  %v709_v47 = vsel %vm431_vm10, %v704_v45, %v706_v31  ;;  %v689_v48 = vsel %vm410_vm9, %v684_v7, %v686_v46  ;;  %v690_v49 = vsel %vm410_vm9, %v686_v46, %v688_v62  ;;  %v735_v50 = vld [vmem:[#allocation5 + $0x8] sm:$0xff] }
 0x23b   : > { %713 = vst [vmem:[#allocation5 + $0x30] sm:$0xf0] %v709_v47  ;;  %v693_v52 = vsel %vm262_vm1, %v689_v48, 0.0  ;;  %v694_v53 = vsel %vm263_vm2, %v690_v49, 0.0  ;;  %v923_v54 = vpack.c.bf16 %v737_v51, %v735_v50  ;;  %v557_v7 = vld [vmem:[%s1215_s3] sm:$0xf] }
 0x23c   : > { %695 = vst [vmem:[#allocation5 + $0x30] sm:$0xf] %v693_v52  ;;  %696 = vst [vmem:[#allocation5 + $0x38] sm:$0xf] %v694_v53 }
 0x23d   : > { %v725_v55 = vpop.permute.xlu0 %724  ;;  %924 = vmatprep.subr.bf16.mxu1 %v923_v54  ;;  %v723_v56 = vpop.permute.xlu1 %722 }
 0x23e   : > { %v727_v57 = vsel %vm449_vm11, %v723_v56, %v725_v55  ;;  %v734_v58 = vld [vmem:[#allocation5] sm:$0xff] }
 0x23f   : > { %v731_v60 = vsel %vm316_vm4, %v727_v57, 0.0  ;;  %v925_v61 = vpack.c.bf16 %v736_v59, %v734_v58 }
 0x240   : > { %733 = vst [vmem:[#allocation5 + $0x48] sm:$0xf] %v731_v60 }
 0x241   : > { %926 = vmatpush1.bf16.msra.mxu1 %v925_v61  ;;  %v721_v24 = vpop.permute.xlu1 %720  ;;  %v739_v62 = vld [vmem:[#allocation5 + $0x28] sm:$0xff]  ;;  %v738_v3 = vld [vmem:[#allocation5 + $0x20] sm:$0xff] }
 0x242   : > { %v726_v25 = vsel %vm449_vm11, %v721_v24, %v723_v56 }
 0x243   : > { %v730_v63 = vsel %vm315_vm7, %v726_v25, 0.0  ;;  %v741_v0 = vld [vmem:[#allocation5 + $0x38] sm:$0xff]  ;;  %v740_v4 = vld [vmem:[#allocation5 + $0x30] sm:$0xff] }
 0x244   : > { %732 = vst [vmem:[#allocation5 + $0x40] sm:$0xf] %v730_v63  ;;  %v927_v5 = vpack.c.bf16 %v741_v0, %v739_v62  ;;  %v929_v6 = vpack.c.bf16 %v740_v4, %v738_v3 }
 0x246   : > { %928 = vmatprep.subr.bf16.mxu1 %v927_v5 }
 0x247   : > { %930 = vmatpush1.bf16.msra.mxu1 %v929_v6  ;;  %v743_v28 = vld [vmem:[#allocation5 + $0x48] sm:$0xf] }
 0x248   : > { %908 = vmatprep.subr.msk.mxu1 %vm477_vm12, %v743_v28 }
 0x24b   : > { %v742_v8 = vld [vmem:[#allocation5 + $0x40] sm:$0xf] }
 0x24c   : > { %909 = vmatpush1.msk.msra.mxu1 %vm477_vm12, %v742_v8 }
 0x24d   : > { %910 = vmatmul.mubr.msk.f32.vlgmr.msra.gmra.mrb[0].mxu1 %vm473_vm13, %v557_v7 }
 0x24e   : > { %v747_v39 = vpop.permute.xlu0 %746 }
 0x320   : > { %v824_v9 = vpop.f32.mrb[0].mxu1 }
 0x321   : > { %v825_v10 = vadd.f32 %v824_v9, %v747_v39  ;;  %v826_v11 = vpop.f32.mrb[1].mxu1 }
 0x322   : > { %v827_v12 = vadd.f32 %v826_v11, %v747_v39 }
 0x323   : > { %v832_v13 = vadd.f32 %v825_v10, %v1026_v1 }
 0x324   : > { %v833_v14 = vadd.f32 %v827_v12, %v1031_v2 }
 0x325   : > { %v834_v15 = vmax.f32 %v832_v13, 0.0 }
 0x326   : > { %v835_v16 = vmax.f32 %v833_v14, 0.0 }
 0x328   : > { %v838_v17 = vcombine.low %v834_v15, %v835_v16 }
 0x32a   : > { %840 = vst [vmem:[%s224_s17] sm:$0xff] %v838_v17 }
 0x32b PF: > { %s15_s18 = sadd.s32 1, %s968_s18  }
 0x32c   : > { %p12_p4 = scmp.ge.s32.totalorder %s15_s18, 4  }
 0x32e   :  { %14 = sbr.rel (!%p12_p4) target bundleno = 1 (0x1), region = 70 }

</bundles_post_ra>
